<compile_context>
chip_gen: v7x
topology: tpu7x:2x2x1
jax: 0.10.0
libtpu: 0.0.40
codegen_flags: <defaults>
</compile_context>

<pallas_src>
import functools

import jax
import jax.numpy as jnp
from jax.experimental import pallas as pl
from jax.experimental.pallas import tpu as pltpu


def _memo_attention_kernel(x_ref, wk_ref, vw_ref, bo_ref, o_ref, *,
                           num_heads, mem_size):
    # x_ref:  (tm, c_in)      one row tile of flattened (batch*seq) activations
    # wk_ref: (c_in, H*m)     folded Wq_h @ (scale*K_h)^T, heads stacked on lanes
    # vw_ref: (H*m, c_out)    folded V_h @ Wo_h^T, heads stacked on rows
    # bo_ref: (1, c_out)      output-projection bias (f32)
    # o_ref:  (tm, c_out)
    x = x_ref[...].astype(wk_ref.dtype)

    # One full-lane-width MXU matmul replaces 2*H narrow per-head matmuls:
    #   sim[:, h*m:(h+1)*m] == (x @ Wq_h) @ (scale * K_h)^T
    sim = jnp.dot(x, wk_ref[...], preferred_element_type=jnp.float32)    # (tm, H*m) f32

    # Per-head segmented softmax: tiny static unroll, VPU/XLU/EUP work only
    # (the MXU sees exactly two big matmuls).  Normalization is applied to the
    # small p operand before the PV matmul; reciprocal runs on the EUP slot.
    m = mem_size
    p_parts = []
    for h in range(num_heads):
        s = sim[:, h * m:(h + 1) * m]                                    # (tm, m)
        s = s - jnp.max(s, axis=-1, keepdims=True)
        e = jnp.exp(s)
        inv_l = pl.reciprocal(jnp.sum(e, axis=-1, keepdims=True), approx=True)
        p_parts.append(e * inv_l)
    p = jnp.concatenate(p_parts, axis=-1).astype(vw_ref.dtype)           # (tm, H*m)

    # Second full-width MXU matmul; implicitly sums att_h @ (V_h @ Wo_h^T).
    y = jnp.dot(p, vw_ref[...], preferred_element_type=jnp.float32)      # (tm, c_out)
    o_ref[...] = (y + bo_ref[...]).astype(o_ref.dtype)


def prepare_memo_attention_weights(wq, k, v, wo, bo, *, num_heads,
                                   param_dtype=None):
    """One-time (model-load-time) weight fold.

    wq: [c_in, c_in] torch-Linear layout [out, in];  k: [m, c_in];
    v:  [m, c_out];  wo: [c_out, c_out] torch layout;  bo: [c_out].
    Returns (WK:(c_in, H*m), VW:(H*m, c_out), bias:(1, c_out) f32).
    Exact rewrite because dropout p=0 and per-row softmax scaling commutes
    with the matmuls (f32 rounding order changes slightly).
    """
    c_in = wq.shape[1]
    m, c_out = v.shape
    hd = c_in // num_heads
    vd = c_out // num_heads
    scale = float(hd) ** (-0.5)

    wq_h = wq.T.reshape(c_in, num_heads, hd).transpose(1, 0, 2)        # (H, c_in, hd)
    kt_h = (k * scale).reshape(m, num_heads, hd).transpose(1, 2, 0)    # (H, hd, m)
    v_h = v.reshape(m, num_heads, vd).transpose(1, 0, 2)               # (H, m, vd)
    wot_h = wo.T.reshape(num_heads, vd, c_out)                         # (H, vd, c_out)

    wk = jnp.einsum('hcd,hdm->chm', wq_h, kt_h).reshape(c_in, num_heads * m)
    vw = jnp.einsum('hmv,hvo->hmo', v_h, wot_h).reshape(num_heads * m, c_out)
    bo2 = bo.reshape(1, c_out).astype(jnp.float32)

    if param_dtype is not None:        # e.g. jnp.bfloat16 for production MXU/DMA
        wk = wk.astype(param_dtype)
        vw = vw.astype(param_dtype)
    return wk, vw, bo2


def memo_attention_pallas(x, wk, vw, bo2, *, num_heads, tile_rows=None,
                          vmem_limit_bytes=None):
    """x: [b, n, c_in]; wk/vw/bo2 from prepare_memo_attention_weights."""
    b, n, c_in = x.shape
    hm, c_out = vw.shape
    assert hm % num_heads == 0
    m = hm // num_heads
    bn = b * n
    x2d = x.reshape(bn, c_in)

    # 256-row tiles: multiple of 128 (v5e MXU) and 256 (v6e/v7x MXU); small
    # enough to fit comfortably in v7x's 64 MiB VMEM with resident weights.
    if tile_rows is None:
        tile_rows = bn if bn <= 256 else 256
    tile_rows = min(tile_rows, bn)
    if tile_rows != bn:
        tile_rows = max(8, (tile_rows // 8) * 8)   # sublane alignment when tiling

    grid = (pl.cdiv(bn, tile_rows),)

    kernel = functools.partial(_memo_attention_kernel,
                               num_heads=num_heads, mem_size=m)

    compiler_kwargs = dict(dimension_semantics=("parallel",))  # v7x: both TCs
    if vmem_limit_bytes is not None:
        compiler_kwargs["vmem_limit_bytes"] = vmem_limit_bytes

    out2d = pl.pallas_call(
        kernel,
        out_shape=jax.ShapeDtypeStruct((bn, c_out), x.dtype),
        grid=grid,
        in_specs=[
            pl.BlockSpec((tile_rows, c_in), lambda i: (i, 0)),   # pipelined x tiles
            pl.BlockSpec((c_in, hm), lambda i: (0, 0)),          # WK: VMEM-resident
            pl.BlockSpec((hm, c_out), lambda i: (0, 0)),         # VW: VMEM-resident
            pl.BlockSpec((1, c_out), lambda i: (0, 0)),          # bias
        ],
        out_specs=pl.BlockSpec((tile_rows, c_out), lambda i: (i, 0)),
        compiler_params=pltpu.CompilerParams(**compiler_kwargs),
    )(x2d, wk, vw, bo2)

    return out2d.reshape(b, n, c_out)


def memo_attention_reference(x, wq, k, v, wo, bo, *, num_heads):
    """Pure-JAX reference mirroring the PyTorch AttentionBase-with-memory path."""
    b, n, c_in = x.shape
    m, c_out = v.shape
    hd = c_in // num_heads
    vd = c_out // num_heads
    scale = float(hd) ** (-0.5)

    q = jnp.einsum('bnc,oc->bno', x, wq)                        # Linear, no bias
    qh = q.reshape(b, n, num_heads, hd).transpose(0, 2, 1, 3)   # b h n hd
    kh = k.reshape(m, num_heads, hd).transpose(1, 0, 2)         # h m hd
    vh = v.reshape(m, num_heads, vd).transpose(1, 0, 2)         # h m vd
    sim = jnp.einsum('bhil,hjl->bhij', qh, kh) * scale
    att = jax.nn.softmax(sim, axis=-1)
    out = jnp.einsum('bhij,hjl->bhil', att, vh)                 # b h n vd
    out = out.transpose(0, 2, 1, 3).reshape(b, n, c_out)
    return jnp.einsum('bnc,oc->bno', out, wo) + bo


if __name__ == "__main__":
    batch = 2
    seq = 8
    memory_size = 16
    in_features = 32
    out_features = 32
    num_heads = 4

    key = jax.random.PRNGKey(0)
    kx, kwq, kk, kv, kwo, kbo = jax.random.split(key, 6)

    x = jax.random.normal(kx, (batch, seq, in_features), dtype=jnp.float32)
    # Deterministic synthetic parameters (shapes match the PyTorch module).
    wq = jax.random.normal(kwq, (in_features, in_features), dtype=jnp.float32) * 0.1
    k_mem = jax.random.normal(kk, (memory_size, in_features), dtype=jnp.float32)
    v_mem = jax.random.normal(kv, (memory_size, out_features), dtype=jnp.float32)
    wo = jax.random.normal(kwo, (out_features, out_features), dtype=jnp.float32) * 0.1
    bo = jax.random.normal(kbo, (out_features,), dtype=jnp.float32) * 0.1

    # One-time, load-time weight fold (hoisted out of the per-call path).
    wk, vw, bo2 = prepare_memo_attention_weights(
        wq, k_mem, v_mem, wo, bo, num_heads=num_heads)

    out = memo_attention_pallas(x, wk, vw, bo2, num_heads=num_heads)
    out = jax.block_until_ready(out)

    ref = memo_attention_reference(x, wq, k_mem, v_mem, wo, bo,
                                   num_heads=num_heads)
    assert out.shape == (batch, seq, out_features)
    # slightly loose tolerance: approximate EUP reciprocal + weight-fold rounding
    assert jnp.allclose(out, ref, atol=2e-3, rtol=2e-3), "mismatch vs reference"

    print("KERNEL_OK")
</pallas_src>

<mosaic_0001>
module attributes {stable_mosaic.version = 11 : i64} {
  func.func @_memo_attention_kernel(%arg0: i32, %arg1: memref<16x32xf32, #tpu.memory_space<vmem>>, %arg2: memref<32x64xf32, #tpu.memory_space<vmem>>, %arg3: memref<64x32xf32, #tpu.memory_space<vmem>>, %arg4: memref<1x32xf32, #tpu.memory_space<vmem>>, %arg5: memref<16x32xf32, #tpu.memory_space<vmem>>) attributes {dimension_semantics = [#tpu.dimension_semantics<parallel>], iteration_bounds = array<i64: 1>, scalar_prefetch = 0 : i64, scratch_operands = 0 : i64, tpu.core_type = #tpu.core_type<tc>, window_params = [{transform_indices = @transform_0, window_bounds = array<i64: 16, 32>}, {pipeline_mode = #tpu.pipeline_mode<synchronous>, transform_indices = @transform_1, window_bounds = array<i64: 32, 64>}, {pipeline_mode = #tpu.pipeline_mode<synchronous>, transform_indices = @transform_2, window_bounds = array<i64: 64, 32>}, {pipeline_mode = #tpu.pipeline_mode<synchronous>, transform_indices = @transform_3, window_bounds = array<i64: 1, 32>}, {transform_indices = @transform_4, window_bounds = array<i64: 16, 32>}]} {
    %c0 = arith.constant 0 : index
    %c0_0 = arith.constant 0 : index
    %0 = vector.load %arg1[%c0, %c0_0] : memref<16x32xf32, #tpu.memory_space<vmem>>, vector<16x32xf32>
    %c0_1 = arith.constant 0 : index
    %c0_2 = arith.constant 0 : index
    %1 = vector.load %arg2[%c0_1, %c0_2] : memref<32x64xf32, #tpu.memory_space<vmem>>, vector<32x64xf32>
    %cst = arith.constant dense<0.000000e+00> : vector<16x64xf32>
    %2 = tpu.matmul %0, %1, %cst {dimension_numbers = #tpu.dot_dimension_numbers<[1], [0], [0], [1], [0, 0, 1, 1], [], []>} : vector<16x32xf32>, vector<32x64xf32>, vector<16x64xf32> -> vector<16x64xf32>
    %3 = vector.extract_strided_slice %2 {offsets = [0, 0], sizes = [16, 16], strides = [1, 1]} : vector<16x64xf32> to vector<16x16xf32>
    %cst_3 = arith.constant dense<0xFF800000> : vector<16xf32>
    %4 = vector.multi_reduction <maximumf>, %3, %cst_3 [1] : vector<16x16xf32> to vector<16xf32>
    %5 = vector.shape_cast %4 : vector<16xf32> to vector<16x1xf32>
    %6 = vector.broadcast %5 : vector<16x1xf32> to vector<16x16xf32>
    %7 = arith.subf %3, %6 : vector<16x16xf32>
    %8 = math.exp %7 : vector<16x16xf32>
    %cst_4 = arith.constant dense<0.000000e+00> : vector<16xf32>
    %9 = vector.multi_reduction <add>, %8, %cst_4 [1] : vector<16x16xf32> to vector<16xf32>
    %10 = vector.shape_cast %9 : vector<16xf32> to vector<16x1xf32>
    %11 = tpu.reciprocal %10 {approx = true} : vector<16x1xf32> -> vector<16x1xf32>
    %12 = vector.broadcast %11 : vector<16x1xf32> to vector<16x16xf32>
    %13 = arith.mulf %8, %12 : vector<16x16xf32>
    %14 = vector.extract_strided_slice %2 {offsets = [0, 16], sizes = [16, 16], strides = [1, 1]} : vector<16x64xf32> to vector<16x16xf32>
    %cst_5 = arith.constant dense<0xFF800000> : vector<16xf32>
    %15 = vector.multi_reduction <maximumf>, %14, %cst_5 [1] : vector<16x16xf32> to vector<16xf32>
    %16 = vector.shape_cast %15 : vector<16xf32> to vector<16x1xf32>
    %17 = vector.broadcast %16 : vector<16x1xf32> to vector<16x16xf32>
    %18 = arith.subf %14, %17 : vector<16x16xf32>
    %19 = math.exp %18 : vector<16x16xf32>
    %cst_6 = arith.constant dense<0.000000e+00> : vector<16xf32>
    %20 = vector.multi_reduction <add>, %19, %cst_6 [1] : vector<16x16xf32> to vector<16xf32>
    %21 = vector.shape_cast %20 : vector<16xf32> to vector<16x1xf32>
    %22 = tpu.reciprocal %21 {approx = true} : vector<16x1xf32> -> vector<16x1xf32>
    %23 = vector.broadcast %22 : vector<16x1xf32> to vector<16x16xf32>
    %24 = arith.mulf %19, %23 : vector<16x16xf32>
    %25 = vector.extract_strided_slice %2 {offsets = [0, 32], sizes = [16, 16], strides = [1, 1]} : vector<16x64xf32> to vector<16x16xf32>
    %cst_7 = arith.constant dense<0xFF800000> : vector<16xf32>
    %26 = vector.multi_reduction <maximumf>, %25, %cst_7 [1] : vector<16x16xf32> to vector<16xf32>
    %27 = vector.shape_cast %26 : vector<16xf32> to vector<16x1xf32>
    %28 = vector.broadcast %27 : vector<16x1xf32> to vector<16x16xf32>
    %29 = arith.subf %25, %28 : vector<16x16xf32>
    %30 = math.exp %29 : vector<16x16xf32>
    %cst_8 = arith.constant dense<0.000000e+00> : vector<16xf32>
    %31 = vector.multi_reduction <add>, %30, %cst_8 [1] : vector<16x16xf32> to vector<16xf32>
    %32 = vector.shape_cast %31 : vector<16xf32> to vector<16x1xf32>
    %33 = tpu.reciprocal %32 {approx = true} : vector<16x1xf32> -> vector<16x1xf32>
    %34 = vector.broadcast %33 : vector<16x1xf32> to vector<16x16xf32>
    %35 = arith.mulf %30, %34 : vector<16x16xf32>
    %36 = vector.extract_strided_slice %2 {offsets = [0, 48], sizes = [16, 16], strides = [1, 1]} : vector<16x64xf32> to vector<16x16xf32>
    %cst_9 = arith.constant dense<0xFF800000> : vector<16xf32>
    %37 = vector.multi_reduction <maximumf>, %36, %cst_9 [1] : vector<16x16xf32> to vector<16xf32>
    %38 = vector.shape_cast %37 : vector<16xf32> to vector<16x1xf32>
    %39 = vector.broadcast %38 : vector<16x1xf32> to vector<16x16xf32>
    %40 = arith.subf %36, %39 : vector<16x16xf32>
    %41 = math.exp %40 : vector<16x16xf32>
    %cst_10 = arith.constant dense<0.000000e+00> : vector<16xf32>
    %42 = vector.multi_reduction <add>, %41, %cst_10 [1] : vector<16x16xf32> to vector<16xf32>
    %43 = vector.shape_cast %42 : vector<16xf32> to vector<16x1xf32>
    %44 = tpu.reciprocal %43 {approx = true} : vector<16x1xf32> -> vector<16x1xf32>
    %45 = vector.broadcast %44 : vector<16x1xf32> to vector<16x16xf32>
    %46 = arith.mulf %41, %45 : vector<16x16xf32>
    %47 = tpu.concatenate %13, %24, %35, %46 in 1 : vector<16x16xf32>, vector<16x16xf32>, vector<16x16xf32>, vector<16x16xf32> -> vector<16x64xf32>
    %c0_11 = arith.constant 0 : index
    %c0_12 = arith.constant 0 : index
    %48 = vector.load %arg3[%c0_11, %c0_12] : memref<64x32xf32, #tpu.memory_space<vmem>>, vector<64x32xf32>
    %cst_13 = arith.constant dense<0.000000e+00> : vector<16x32xf32>
    %49 = tpu.matmul %47, %48, %cst_13 {dimension_numbers = #tpu.dot_dimension_numbers<[1], [0], [0], [1], [0, 0, 1, 1], [], []>} : vector<16x64xf32>, vector<64x32xf32>, vector<16x32xf32> -> vector<16x32xf32>
    %c0_14 = arith.constant 0 : index
    %c0_15 = arith.constant 0 : index
    %50 = vector.load %arg4[%c0_14, %c0_15] : memref<1x32xf32, #tpu.memory_space<vmem>>, vector<1x32xf32>
    %51 = vector.broadcast %50 : vector<1x32xf32> to vector<16x32xf32>
    %52 = arith.addf %49, %51 : vector<16x32xf32>
    %c0_16 = arith.constant 0 : index
    %c0_17 = arith.constant 0 : index
    %53 = vector.load %arg5[%c0_16, %c0_17] : memref<16x32xf32, #tpu.memory_space<vmem>>, vector<16x32xf32>
    tpu.vector_store %arg5[%c0_16, %c0_17], %52 {strides = array<i32>} : memref<16x32xf32, #tpu.memory_space<vmem>>, vector<16x32xf32>,
    return
  }
  func.func @transform_0(%arg0: i32) -> (i32, i32) {
    %c0_i32 = arith.constant 0 : i32
    %c0_i32_0 = arith.constant 0 : i32
    return %arg0, %c0_i32 : i32, i32
  }
  func.func @transform_1(%arg0: i32) -> (i32, i32) {
    %c0_i32 = arith.constant 0 : i32
    %c0_i32_0 = arith.constant 0 : i32
    %c0_i32_1 = arith.constant 0 : i32
    return %c0_i32, %c0_i32_0 : i32, i32
  }
  func.func @transform_2(%arg0: i32) -> (i32, i32) {
    %c0_i32 = arith.constant 0 : i32
    %c0_i32_0 = arith.constant 0 : i32
    %c0_i32_1 = arith.constant 0 : i32
    return %c0_i32, %c0_i32_0 : i32, i32
  }
  func.func @transform_3(%arg0: i32) -> (i32, i32) {
    %c0_i32 = arith.constant 0 : i32
    %c0_i32_0 = arith.constant 0 : i32
    %c0_i32_1 = arith.constant 0 : i32
    return %c0_i32, %c0_i32_0 : i32, i32
  }
  func.func @transform_4(%arg0: i32) -> (i32, i32) {
    %c0_i32 = arith.constant 0 : i32
    %c0_i32_0 = arith.constant 0 : i32
    return %arg0, %c0_i32 : i32, i32
  }
}

</mosaic_0001>

<bundles_post_ra>
// kernel: tpu_custom_call.1
= control target key start
LH: loop header
LB: loop body
LE: loop exit
PB: predicated region body
PF: predicated region fallthrough
CT: control target
= control target key end

     0   :  { %vm24_vm0 = vcmask 261120   ;;  %s629_s0 = inlined_call_operand.vmem [shape: f32[16,32], index: 0, kind: input, shape index: {}]   ;;  %s630_s1 = inlined_call_operand.vmem [shape: f32[32,64], index: 1, kind: input, shape index: {}]   ;;  %s631_s2 = inlined_call_operand.vmem [shape: f32[64,32], index: 2, kind: input, shape index: {}]   ;;  %s632_s3 = inlined_call_operand.vmem [shape: f32[1,32], index: 3, kind: input, shape index: {}]   ;;  %s633_s4 = inlined_call_operand.hbm [shape: f32[16,32], index: 4, kind: output, shape index: {}]  }
   0x1   :  { %v20_v0 = vld [vmem:[%s630_s1] sm:$0xff]  ;;  %v21_v1 = vld [vmem:[%s630_s1 + $0x8] sm:$0xff]  ;;  %v22_v2 = vld [vmem:[%s630_s1 + $0x10] sm:$0xff] }
   0x2   :  { %v395_v3 = vpack.c.bf16 %v21_v1, %v20_v0  ;;  %v23_v4 = vld [vmem:[%s630_s1 + $0x18] sm:$0xff]  ;;  %v18_v5 = vld [vmem:[%s629_s0] sm:$0xff] }
   0x3   :  { %v399_v6 = vpack.c.bf16 %v23_v4, %v22_v2  ;;  %373 = vmatprep.mubr.msk.f32.mxu0 %vm24_vm0, %v18_v5 }
   0x4   :  { %9 = vsyncpa [#allocation3], 0  ;;  %396 = vmatprep.subr.bf16.mxu0 %v395_v3  ;;  %v19_v7 = vld [vmem:[%s629_s0 + $0x8] sm:$0xff]  ;;  %vm160_vm1 = vcmask 392448   ;;  %vm129_vm2 = vcmask 261248   ;;  %vm191_vm3 = vcmask 523648  }
   0x5   :  { %398 = vmatpush3.bf16.msra.mxu0 %v395_v3  ;;  %vm106_vm4 = vcmask 130048   ;;  %s481_s0 = smov 112   ;;  %s482_s1 = smov 96   ;;  %v229_v0 = vld [vmem:[%s631_s2] sm:$0xff]  ;;  %v230_v1 = vld [vmem:[%s631_s2 + $0x8] sm:$0xff]  ;;  %v231_v3 = vld [vmem:[%s631_s2 + $0x10] sm:$0xff] }
   0x6   :  { %400 = vmatprep.subr.bf16.mxu0 %v399_v6  ;;  %s483_s27 = smov 80   ;;  %v403_v2 = vpack.c.bf16 %v230_v1, %v229_v0  ;;  %v232_v4 = vld [vmem:[%s631_s2 + $0x18] sm:$0xff]  ;;  %v233_v5 = vld [vmem:[%s631_s2 + $0x20] sm:$0xff]  ;;  %vm226_vm5 = vcmask 392192   ;;  %vm244_vm6 = vcmask 523264   ;;  %s484_s19 = smov [#allocation2]  }
   0x7   :  { %s333_s20 = sshll.u32 %s484_s19, 4  ;;  %s334_s20 = int_to_ptr.vmem [resolvable:$true] %s333_s20 }
   0x8   :  { %404 = vmatprep.subr.bf16.mxu1 %v403_v2  ;;  %s457_s21 = scalar_lea.vmem %s334_s20, 256  ;;  %p462_p1 = scmp.lt.s32.totalorder %s334_s20, %s334_s20 }
   0x9   :  { %402 = vmatpush3.bf16.msra.mxu0 %v399_v6  ;;  %406 = vmatpush3.bf16.msra.mxu1 %v403_v2  ;;  %v407_v6 = vpack.c.bf16 %v232_v4, %v231_v3  ;;  %p458_p0 = scmp.ne.s32.totalorder %s334_s20, %s457_s21  ;;  %p463_p2 = scmp.lt.s32.totalorder %s457_s21, %s457_s21 }
   0xb   :  { %408 = vmatprep.subr.bf16.mxu1 %v407_v6  ;;  %p464_p3 = por %p463_p2, %p462_p1 }
   0xc   :  { %374 = vmatmul.mubr.msk.f32.vlgmr.msra.gmra.mrb[0].mxu0 %vm24_vm0, %v19_v7  ;;  %v234_v7 = vld [vmem:[%s631_s2 + $0x28] sm:$0xff] }
   0xd   :  { %410 = vmatpush3.bf16.msra.mxu1 %v407_v6  ;;  %p465_p4 = pnand %p464_p3, %p458_p0 }
  0xdf   :  { %v375_v8 = vpop.f32.mrb[0].mxu0 }
  0xe0   :  { %v532_v9 = vpop.f32.mrb[1].mxu0  ;;  %v164_v10 = vsel %vm160_vm1, %v375_v8, -inf  ;;  %v133_v11 = vsel %vm129_vm2, %v375_v8, -inf  ;;  %v195_v14 = vsel %vm191_vm3, %v375_v8, -inf  ;;  %v110_v16 = vsel %vm106_vm4, %v375_v8, -inf }
  0xe1   :  { %165 = vmax.xlane.f32.xlu1 %v164_v10  ;;  %134 = vmax.xlane.f32.xlu0 %v133_v11  ;;  %v161_v12 = vsel %vm160_vm1, %v532_v9, -inf  ;;  %v130_v13 = vsel %vm129_vm2, %v532_v9, -inf  ;;  %v192_v15 = vsel %vm191_vm3, %v532_v9, -inf  ;;  %v107_v17 = vsel %vm106_vm4, %v532_v9, -inf  ;;  %v236_v10 = vld [vmem:[%s631_s2 + $0x38] sm:$0xff] }
  0xe5   :  { %162 = vmax.xlane.f32.xlu1 %v161_v12  ;;  %131 = vmax.xlane.f32.xlu0 %v130_v13 }
  0xe9   :  { %196 = vmax.xlane.f32.xlu1 %v195_v14  ;;  %193 = vmax.xlane.f32.xlu0 %v192_v15 }
  0xed   :  { %111 = vmax.xlane.f32.xlu1 %v110_v16  ;;  %108 = vmax.xlane.f32.xlu0 %v107_v17 }
 0x16e   :  { %v166_v18 = vpop.xlane.xlu1 %165  ;;  %v135_v19 = vpop.xlane.xlu0 %134 }
 0x16f   :  { %v168_v20 = vsub.f32 %v375_v8, %v166_v18  ;;  %v137_v21 = vsub.f32 %v375_v8, %v135_v19 }
 0x171   :  { %v140_v22 = vmul.f32 1.442695, %v137_v21  ;;  %v171_v25 = vmul.f32 1.442695, %v168_v20 }
 0x172   :  { %v163_v23 = vpop.xlane.xlu1 %162  ;;  %v132_v24 = vpop.xlane.xlu0 %131 }
 0x173   :  { %v167_v26 = vsub.f32 %v532_v9, %v163_v23  ;;  %v136_v27 = vsub.f32 %v532_v9, %v132_v24  ;;  %425 = vpow2.f32 %v140_v22 }
 0x174   :  { %427 = vpow2.f32 %v171_v25 }
 0x175   :  { %v138_v28 = vmul.f32 1.442695, %v136_v27  ;;  %v169_v31 = vmul.f32 1.442695, %v167_v26 }
 0x176   :  { %v197_v29 = vpop.xlane.xlu1 %196  ;;  %v194_v30 = vpop.xlane.xlu0 %193 }
 0x177   :  { %v198_v32 = vsub.f32 %v532_v9, %v194_v30  ;;  %429 = vpow2.f32 %v138_v28  ;;  %v199_v33 = vsub.f32 %v375_v8, %v197_v29 }
 0x178   :  { %431 = vpow2.f32 %v169_v31 }
 0x179   :  { %v200_v34 = vmul.f32 1.442695, %v198_v32  ;;  %v202_v35 = vmul.f32 1.442695, %v199_v33 }
 0x17a   :  { %v112_v42 = vpop.xlane.xlu1 %111  ;;  %v109_v44 = vpop.xlane.xlu0 %108 }
 0x17b   :  { %433 = vpow2.f32 %v200_v34  ;;  %v114_v43 = vsub.f32 %v375_v8, %v112_v42  ;;  %v113_v46 = vsub.f32 %v532_v9, %v109_v44  ;;  %v411_v8 = vpack.c.bf16 %v234_v7, %v233_v5  ;;  %v235_v9 = vld [vmem:[%s631_s2 + $0x30] sm:$0xff] }
 0x17c   :  { %435 = vpow2.f32 %v202_v35  ;;  %v415_v11 = vpack.c.bf16 %v236_v10, %v235_v9 }
 0x17d   :  { %v543_v36 = vpop.eup %425  ;;  %v117_v45 = vmul.f32 1.442695, %v114_v43  ;;  %v115_v47 = vmul.f32 1.442695, %v113_v46  ;;  %412 = vmatprep.subr.bf16.mxu1 %v411_v8 }
 0x17e   :  { %146 = vrot.lane.b32.xlu1 %v543_v36, %s481_s0  ;;  %v546_v37 = vpop.eup %427  ;;  %414 = vmatpush3.bf16.msra.mxu1 %v411_v8 }
 0x17f   :  { %437 = vpow2.f32 %v117_v45  ;;  %416 = vmatprep.subr.bf16.mxu1 %v415_v11 }
 0x180   :  { %439 = vpow2.f32 %v115_v47 }
 0x181   :  { %v548_v38 = vpop.eup %429 }
 0x182   :  { %177 = vrot.lane.b32.xlu1 %v546_v37, %s482_s1  ;;  %144 = vrot.lane.b32.xlu0 %v548_v38, %s481_s0  ;;  %v552_v39 = vpop.eup %431 }
 0x183   :  { %418 = vmatpush3.bf16.msra.mxu1 %v415_v11 }
 0x185   :  { %v554_v40 = vpop.eup %433 }
 0x186   :  { %175 = vrot.lane.b32.xlu1 %v552_v39, %s482_s1  ;;  %206 = vrot.lane.b32.xlu0 %v554_v40, %s483_s27  ;;  %v558_v41 = vpop.eup %435 }
 0x189   :  { %v562_v48 = vpop.eup %437 }
 0x18a   :  { %208 = vrot.lane.b32.xlu1 %v558_v41, %s483_s27  ;;  %v122_v49 = vsel %vm106_vm4, %v562_v48, 0.0  ;;  %v566_v50 = vpop.eup %439 }
 0x18b   :  { %v119_v51 = vsel %vm106_vm4, %v566_v50, 0.0 }
 0x1a5   :  { %123 = vadd.xlane.f32.xlu0 %v122_v49 }
 0x1a9   :  { %120 = vadd.xlane.f32.xlu0 %v119_v51 }
 0x1f0   :  { %v147_v52 = vpop.permute.xlu1 %146 }
 0x1f1   :  { %v153_v53 = vsel %vm106_vm4, %v147_v52, 0.0 }
 0x1f2   :  { %154 = vadd.xlane.f32.xlu0 %v153_v53 }
 0x1f4   :  { %v178_v54 = vpop.permute.xlu1 %177  ;;  %v145_v55 = vpop.permute.xlu0 %144 }
 0x1f5   :  { %v184_v56 = vsel %vm106_vm4, %v178_v54, 0.0  ;;  %v150_v59 = vsel %vm106_vm4, %v145_v55, 0.0 }
 0x1f6   :  { %185 = vadd.xlane.f32.xlu1 %v184_v56 }
 0x1f8   :  { %v176_v57 = vpop.permute.xlu1 %175  ;;  %v207_v60 = vpop.permute.xlu0 %206 }
 0x1f9   :  { %v181_v58 = vsel %vm106_vm4, %v176_v57, 0.0  ;;  %v212_v63 = vsel %vm106_vm4, %v207_v60, 0.0 }
 0x1fa   :  { %182 = vadd.xlane.f32.xlu0 %v181_v58  ;;  %151 = vadd.xlane.f32.xlu1 %v150_v59 }
 0x1fc   :  { %v209_v61 = vpop.permute.xlu1 %208 }
 0x1fd   :  { %v215_v62 = vsel %vm106_vm4, %v209_v61, 0.0 }
 0x1fe   :  { %216 = vadd.xlane.f32.xlu1 %v215_v62  ;;  %213 = vadd.xlane.f32.xlu0 %v212_v63 }
 0x232   :  { %v124_v12 = vpop.xlane.xlu0 %123 }
 0x233   :  { %441 = vrcp.f32 %v124_v12 }
 0x236   :  { %v121_v13 = vpop.xlane.xlu0 %120 }
 0x237   :  { %443 = vrcp.f32 %v121_v13 }
 0x23d   :  { %v442_v20 = vpop.eup %441 }
 0x23e   :  { %v128_v30 = vmul.f32 %v442_v20, %v562_v48 }
 0x241   :  { %v444_v21 = vpop.eup %443 }
 0x242   :  { %v127_v28 = vmul.f32 %v444_v21, %v566_v50 }
 0x27f   :  { %v155_v14 = vpop.xlane.xlu0 %154 }
 0x280   :  { %445 = vrcp.f32 %v155_v14 }
 0x283   :  { %v186_v15 = vpop.xlane.xlu1 %185 }
 0x284   :  { %447 = vrcp.f32 %v186_v15 }
 0x287   :  { %v152_v16 = vpop.xlane.xlu1 %151  ;;  %v183_v17 = vpop.xlane.xlu0 %182 }
 0x288   :  { %449 = vrcp.f32 %v152_v16 }
 0x289   :  { %451 = vrcp.f32 %v183_v17 }
 0x28a   :  { %v446_v22 = vpop.eup %445 }
 0x28b   :  { %v217_v18 = vpop.xlane.xlu1 %216  ;;  %v214_v19 = vpop.xlane.xlu0 %213  ;;  %v159_v26 = vmul.f32 %v446_v22, %v543_v36 }
 0x28c   :  { %453 = vrcp.f32 %v217_v18 }
 0x28d   :  { %455 = vrcp.f32 %v214_v19  ;;  %v223_v42 = vsel %vm106_vm4, %v128_v30, %v159_v26 }
 0x28e   :  { %v448_v23 = vpop.eup %447 }
 0x28f   :  { %v190_v29 = vmul.f32 %v448_v23, %v546_v37 }
 0x292   :  { %v450_v24 = vpop.eup %449 }
 0x293   :  { %v452_v25 = vpop.eup %451  ;;  %v158_v27 = vmul.f32 %v450_v24, %v548_v38  ;;  %v225_v38 = vsel %vm24_vm0, %v223_v42, %v190_v29 }
 0x294   :  { %v189_v31 = vmul.f32 %v452_v25, %v552_v39  ;;  %v346_v39 = vld [vmem:[%s632_s3] ss:$0 sm:$0xff] }
 0x295   :  { %v222_v33 = vsel %vm106_vm4, %v127_v28, %v158_v27 }
 0x296   :  { %v454_v32 = vpop.eup %453  ;;  %v224_v37 = vsel %vm24_vm0, %v222_v33, %v189_v31 }
 0x297   :  { %v456_v34 = vpop.eup %455  ;;  %v221_v35 = vmul.f32 %v454_v32, %v558_v41 }
 0x298   :  { %v220_v36 = vmul.f32 %v456_v34, %v554_v40 }
 0x299   :  { %v228_v43 = vsel %vm226_vm5, %v225_v38, %v221_v35 }
 0x29a   :  { %v227_v44 = vsel %vm226_vm5, %v224_v37, %v220_v36 }
 0x29b   :  { %392 = vmatprep.mubr.msk.f32.mxu1 %vm244_vm6, %v227_v44 }
 0x29c   :  { %393 = vmatmul.mubr.msk.f32.vlgmr.msra.gmra.mrb[0].mxu1 %vm244_vm6, %v228_v43 }
 0x36f   :  { %v394_v41 = vpop.f32.mrb[0].mxu1 }
 0x370   :  { %v323_v45 = vadd.f32 %v394_v41, %v346_v39  ;;  %v317_v46 = vpop.f32.mrb[1].mxu1 }
 0x371   :  { %v318_v40 = vadd.f32 %v346_v39, %v317_v46 }
 0x372   :  { %327 = vst.msk [vmem:[#allocation2 + $0x8] sm:$0xff] %vm24_vm0, %v323_v45 }
 0x373   :  { %326 = vst.msk [vmem:[#allocation2] sm:$0xff] %vm24_vm0, %v318_v40 }
 0x374   :  { %468 = shalt.err (!%p465_p4)
}
 0x375   :  { %s469_s23 = scalar_lea.hbm %s633_s4, 256 }
 0x376   :  { %p470_p5 = scmp.ne.s32.totalorder %s633_s4, %s469_s23  ;;  %p473_p6 = scmp.lt.u32.totalorder %s469_s23, %s633_s4 }
 0x378   :  { %p475_p7 = pnand %p473_p6, %p470_p5 }
 0x37a   :  { %478 = shalt.err (!%p475_p7)
}
 0x37b   :  { %s485_s1 = smov 128   ;;  %s486_s27 = smov 8  }
 0x37c   :  { %339 = dma.vmem_to_hbm [thread:$0]  %s334_s20, 256, %s633_s4, [#allocation3], %s485_s1, %s485_s1, %s486_s27  }
 0x37d   :  { %479 = dma.done.wait [#allocation3], 256  }
 0x37e   :  { %480 = vsyncadd [#allocation3], 4294967040 }
 0x37f   :  { %343 = vsyncpa [#allocation3], 1 }

</bundles_post_ra>
